<compile_context>
chip_gen: v7x
topology: tpu7x:2x2x1
jax: 0.10.0
libtpu: 0.0.40
codegen_flags: <defaults>
</compile_context>

<pallas_src>
import jax
import jax.numpy as jnp
from jax import lax
from jax.experimental import pallas as pl
from jax.experimental.pallas import tpu as pltpu

_LANES = 128
_MAX_BLOCK_ROWS = 8192            # ~4 MiB per f32 operand block
_TARGET_DBUF_BYTES = 26 << 20     # target double-buffered VMEM footprint


def _sublane_tile(dtype):
    return {4: 8, 2: 16, 1: 32}.get(jnp.dtype(dtype).itemsize, 8)


def _round_up(v, m):
    return -(-v // m) * m


def _spike_only_kernel(params_ref, x_ref, spike_ref):
    threshold = params_ref[0]                      # SMEM scalar, free on scalar slot
    mem = x_ref[...].astype(jnp.float32)
    spike_ref[...] = (mem >= threshold).astype(spike_ref.dtype)


def _spike_mem_kernel(params_ref, x_ref, spike_ref, mem_ref):
    threshold = params_ref[0]
    reset_value = params_ref[1]
    mem = x_ref[...].astype(jnp.float32)
    fired = mem >= threshold
    spike_ref[...] = fired.astype(spike_ref.dtype)
    # (1 - spike) * mem + spike * reset  ==  where(fired, reset, mem)
    mem_ref[...] = jnp.where(fired, reset_value, mem)


def _elementwise_forward(x_flat, threshold, reset_value, spike_dtype):
    """Plain-jnp forward for tiny arrays / the <128-element ragged tail."""
    mem = x_flat.astype(jnp.float32)
    fired = mem >= jnp.asarray(threshold, jnp.float32)
    spike = fired.astype(spike_dtype)
    mem_out = jnp.where(fired, jnp.asarray(reset_value, jnp.float32), mem)
    return spike, mem_out


def spiking_neuron(x, threshold=1.0, reset_value=0.0, *,
                   return_membrane=False, spike_dtype=jnp.float32):
    """SpikingNeuron forward.

    Returns `spike` (default float32, same shape as x), matching PyTorch
    forward().  If return_membrane=True, also returns the post-reset membrane
    potential (the module's internal state) as a float32 array.
    """
    orig_shape = x.shape
    total = x.size
    x_flat = x.reshape(-1)
    spike_dtype = jnp.dtype(spike_dtype)
    mem_dtype = jnp.dtype(jnp.float32)

    aligned = (total // _LANES) * _LANES
    rows = aligned // _LANES
    tail = total - aligned

    # Arrays smaller than one 128-lane row: not worth a kernel launch.
    if rows == 0:
        spike, mem = _elementwise_forward(x_flat, threshold, reset_value, spike_dtype)
        spike = spike.reshape(orig_shape)
        if return_membrane:
            return spike, mem.reshape(orig_shape)
        return spike

    # 128-aligned prefix as a lane-dense 2D slab (free reshape; no pad copy).
    if tail == 0:
        x2d = x_flat.reshape(rows, _LANES)
    else:
        x2d = lax.slice(x_flat, (0,), (aligned,)).reshape(rows, _LANES)

    sublane = _sublane_tile(x.dtype)
    out_itemsize = spike_dtype.itemsize + (mem_dtype.itemsize if return_membrane else 0)
    bytes_per_row = _LANES * (jnp.dtype(x.dtype).itemsize + out_itemsize)

    # Rows per block allowed by the double-buffered VMEM budget.
    vmem_rows = max(sublane,
                    ((_TARGET_DBUF_BYTES // 2) // bytes_per_row) // sublane * sublane)
    cap = min(_MAX_BLOCK_ROWS, vmem_rows)
    if rows <= sublane:
        block_rows = rows                                   # single block == full dim
    else:
        # >= 2 grid blocks so "parallel" can shard across v7x's 2 TensorCores.
        half = _round_up(-(-rows // 2), sublane)
        block_rows = max(sublane, min(cap, half))
    grid = (pl.cdiv(rows, block_rows),)                     # tail block masked by Pallas

    blk = lambda i: (i, 0)
    in_specs = [
        pl.BlockSpec(memory_space=pltpu.MemorySpace.SMEM),  # [threshold, reset_value]
        pl.BlockSpec((block_rows, _LANES), blk),
    ]

    if return_membrane:
        kernel = _spike_mem_kernel
        out_shape = (jax.ShapeDtypeStruct((rows, _LANES), spike_dtype),
                     jax.ShapeDtypeStruct((rows, _LANES), mem_dtype))
        out_specs = (pl.BlockSpec((block_rows, _LANES), blk),
                     pl.BlockSpec((block_rows, _LANES), blk))
    else:
        kernel = _spike_only_kernel
        out_shape = jax.ShapeDtypeStruct((rows, _LANES), spike_dtype)
        out_specs = pl.BlockSpec((block_rows, _LANES), blk)

    elems = rows * _LANES
    cost = pl.CostEstimate(
        flops=2 * elems,
        transcendentals=0,
        bytes_accessed=elems * (jnp.dtype(x.dtype).itemsize + out_itemsize),
    )

    # Explicit scoped-VMEM budget: covers v5e's 16 MiB default, stays well
    # under v7x's 64 MiB physical VMEM.
    dbuf_bytes = 2 * block_rows * bytes_per_row
    vmem_limit = int(min(48 << 20, max(32 << 20, dbuf_bytes + (8 << 20))))

    # Runtime SMEM scalars -> no recompile per distinct threshold/reset value.
    params = jnp.asarray([threshold, reset_value], dtype=jnp.float32)

    result = pl.pallas_call(
        kernel,
        out_shape=out_shape,
        grid_spec=pltpu.PrefetchScalarGridSpec(
            num_scalar_prefetch=0,
            grid=grid,
            in_specs=in_specs,
            out_specs=out_specs,
        ),
        compiler_params=pltpu.CompilerParams(
            dimension_semantics=("parallel",),
            vmem_limit_bytes=vmem_limit,
        ),
        cost_estimate=cost,
    )(params, x2d)

    if return_membrane:
        spike2d, mem2d = result
        spike_flat = spike2d.reshape(-1)
        mem_flat = mem2d.reshape(-1)
        if tail:
            spike_t, mem_t = _elementwise_forward(
                x_flat[aligned:], threshold, reset_value, spike_dtype)
            spike_flat = jnp.concatenate([spike_flat, spike_t])
            mem_flat = jnp.concatenate([mem_flat, mem_t])
        return spike_flat.reshape(orig_shape), mem_flat.reshape(orig_shape)

    spike_flat = result.reshape(-1)
    if tail:
        spike_t, _ = _elementwise_forward(
            x_flat[aligned:], threshold, reset_value, spike_dtype)
        spike_flat = jnp.concatenate([spike_flat, spike_t])
    return spike_flat.reshape(orig_shape)


def _reference(x, threshold=1.0, reset_value=0.0):
    mem = jnp.zeros_like(x, dtype=jnp.float32) + x.astype(jnp.float32)
    spike = (mem >= threshold).astype(jnp.float32)
    mem = (1.0 - spike) * mem + spike * reset_value
    return spike, mem


if __name__ == "__main__":
    key = jax.random.PRNGKey(0)

    # 128-aligned NCHW case (zero-copy reshape; grid split into >=2 blocks).
    x = jax.random.normal(key, (2, 4, 16, 16), dtype=jnp.float32) * 2.0

    spike = jax.block_until_ready(spiking_neuron(x, threshold=1.0, reset_value=0.0))
    ref_spike, ref_mem = _reference(x, 1.0, 0.0)
    assert spike.shape == x.shape and spike.dtype == jnp.float32
    assert jnp.array_equal(spike, ref_spike)

    # Two-output path (spike + updated internal membrane state).
    spike2, mem2 = spiking_neuron(x, threshold=1.0, reset_value=0.0,
                                  return_membrane=True)
    spike2, mem2 = jax.block_until_ready((spike2, mem2))
    assert jnp.array_equal(spike2, ref_spike)
    assert jnp.allclose(mem2, ref_mem)

    # Different threshold/reset values reuse the same compiled kernel (SMEM
    # scalars), and a ragged size exercises the aligned-prefix + jnp-tail path.
    key2 = jax.random.PRNGKey(1)
    y = jax.random.normal(key2, (3, 5, 7, 11), dtype=jnp.float32) * 2.0
    spike_y, mem_y = spiking_neuron(y, threshold=0.5, reset_value=-0.25,
                                    return_membrane=True)
    spike_y, mem_y = jax.block_until_ready((spike_y, mem_y))
    ref_spike_y, ref_mem_y = _reference(y, 0.5, -0.25)
    assert jnp.array_equal(spike_y, ref_spike_y)
    assert jnp.allclose(mem_y, ref_mem_y)

    # Narrow-output path: bf16 input, bf16 spike (0.0/1.0 exact in bf16).
    key3 = jax.random.PRNGKey(2)
    z = jax.random.normal(key3, (2, 8, 128), dtype=jnp.bfloat16) * 2
    spike_z = jax.block_until_ready(
        spiking_neuron(z, threshold=1.0, reset_value=0.0,
                       spike_dtype=jnp.bfloat16))
    ref_spike_z = (z.astype(jnp.float32) >= 1.0).astype(jnp.float32)
    assert spike_z.dtype == jnp.bfloat16
    assert jnp.array_equal(spike_z.astype(jnp.float32), ref_spike_z)

    print("KERNEL_OK")
</pallas_src>

<mosaic_0001>
module attributes {stable_mosaic.version = 11 : i64} {
  func.func @_spike_only_kernel(%arg0: i32, %arg1: memref<2xf32, #tpu.memory_space<smem>>, %arg2: memref<8x128xf32, #tpu.memory_space<vmem>>, %arg3: memref<8x128xf32, #tpu.memory_space<vmem>>) attributes {dimension_semantics = [#tpu.dimension_semantics<parallel>], iteration_bounds = array<i64: 2>, scalar_prefetch = 0 : i64, scratch_operands = 0 : i64, tpu.core_type = #tpu.core_type<tc>, window_params = [{transform_indices = @transform_0, window_bounds = array<i64: 2>}, {transform_indices = @transform_1, window_bounds = array<i64: 8, 128>}, {transform_indices = @transform_2, window_bounds = array<i64: 8, 128>}]} {
    %c0 = arith.constant 0 : index
    %0 = memref.load %arg1[%c0] : memref<2xf32, #tpu.memory_space<smem>>
    %c0_0 = arith.constant 0 : index
    %c0_1 = arith.constant 0 : index
    %1 = vector.load %arg2[%c0_0, %c0_1] : memref<8x128xf32, #tpu.memory_space<vmem>>, vector<8x128xf32>
    %2 = vector.broadcast %0 : f32 to vector<8x128xf32>
    %3 = arith.cmpf oge, %1, %2 : vector<8x128xf32>
    %4 = arith.extui %3 : vector<8x128xi1> to vector<8x128xi32>
    %5 = arith.sitofp %4 : vector<8x128xi32> to vector<8x128xf32>
    %c0_2 = arith.constant 0 : index
    %c0_3 = arith.constant 0 : index
    %6 = vector.load %arg3[%c0_2, %c0_3] : memref<8x128xf32, #tpu.memory_space<vmem>>, vector<8x128xf32>
    tpu.vector_store %arg3[%c0_2, %c0_3], %5 {strides = array<i32>} : memref<8x128xf32, #tpu.memory_space<vmem>>, vector<8x128xf32>,
    return
  }
  func.func @transform_0(%arg0: i32) -> i32 {
    %c0_i32 = arith.constant 0 : i32
    %c0_i32_0 = arith.constant 0 : i32
    return %c0_i32 : i32
  }
  func.func @transform_1(%arg0: i32) -> (i32, i32) {
    %c0_i32 = arith.constant 0 : i32
    %c0_i32_0 = arith.constant 0 : i32
    return %arg0, %c0_i32 : i32, i32
  }
  func.func @transform_2(%arg0: i32) -> (i32, i32) {
    %c0_i32 = arith.constant 0 : i32
    %c0_i32_0 = arith.constant 0 : i32
    return %arg0, %c0_i32 : i32, i32
  }
}

</mosaic_0001>

<bundles_post_ra>
// kernel: tpu_custom_call.1
= control target key start
LH: loop header
LB: loop body
LE: loop exit
PB: predicated region body
PF: predicated region fallthrough
CT: control target
= control target key end

     0   :  { %7 = vsyncpa [#allocation5], 0  ;;  %s686_s0 = inlined_call_operand.hbm [shape: f32[2], index: 0, kind: input, shape index: {}]   ;;  %s687_s1 = inlined_call_operand.hbm [shape: f32[16,128], index: 1, kind: input, shape index: {}]   ;;  %s688_s2 = inlined_call_operand.hbm [shape: f32[16,128], index: 2, kind: output, shape index: {}]  }
   0x1   :  { %8 = vsyncpa [#allocation3], 0 }
   0x2   :  { %10 = vsyncpa [#allocation3 + $0x1], 0 }
   0x3   :  { %11 = vsyncpa [#allocation4], 0 }
   0x4   :  { %13 = vsyncpa [#allocation4 + $0x1], 0  ;;  %s481_s9 = smov 0   ;;  %s483_s10 = smov 0  }
   0x5   :  { %s485_s11 = smov 0   ;;  %s487_s12 = smov 0  }
   0x6 LB: > { %s502_s13 = sadd.s32 4294967295, %s460_s12   ;;  %s274_s14 = sadd.s32 4294967294, %s460_s12   ;;  %s460_s12 = sphi %s487_s12, %s709_s12   ;;  %s456_s11 = sphi %s485_s11, %s708_s11   ;;  %s452_s10 = sphi %s483_s10, %s707_s10   ;;  %s448_s9 = sphi %s481_s9, %s706_s9  }
   0x7   : > { %p60_p0 = scmp.ne.s32.totalorder %s452_s10, %s448_s9  ;;  %p689_p1 = scmp.eq.s32.totalorder %s502_s13, 0 }
   0x8   : > { %p90_p3 = scmp.eq.s32.totalorder %s274_s14, 1  ;;  %p275_p5 = scmp.ge.s32.totalorder %s460_s12, 1 }
   0x9   : > { %p511_p4 = por %p689_p1, %p60_p0  ;;  %p97_p7 = scmp.lt.s32.totalorder %s460_s12, 3 }
   0xa   : > { %p516_p6 = por %p90_p3, %p60_p0  ;;  %s527_s18 = sadd.s32 1, %s460_s12  }
   0xb   : > { %s692_s15 = scalar_select %p511_p4, 1, 0 }
   0xc   : > { %s693_s16 = scalar_select %p516_p6, 1, 0 }
   0xd   : > { %p521_p8 = pnand %p275_p5, %p97_p7  ;;  %s44_s19 = ssub.s32 %s460_s12, %s527_s18 }
   0xe   : > { %s47_s20 = sadd.s32 1, %s456_s11  ;;  %p540_p12 = scmp.eq.s32.totalorder %s44_s19, 0 }
   0xf   : > { %p297_p10 = pneg %p521_p8  ;;  %p54_p13 = scmp.ne.s32.totalorder %s456_s11, %s452_s10 }
  0x10   : > { %p55_p0 = scmp.eq.s32.totalorder %s460_s12, 0  ;;  %p310_p3 = scmp.lt.s32.totalorder %s460_s12, 2 }
  0x11   : > { %p536_p11 = pnand %p297_p10, %p689_p1  ;;  %s347_s25 = scalar_lea.hbm %s686_s0, 16 }
  0x12   : > { %p348_p5 = scmp.ne.s32.totalorder %s686_s0, %s347_s25  ;;  %p354_p1 = scmp.lt.u32.totalorder %s347_s25, %s686_s0 }
  0x13   : > { %p349_p7 = pneg %p536_p11 }
  0x15   : > { %p350_p10 = pnand %p349_p7, %p348_p5 }
  0x17   : > { %p351_p9 = pneg %p350_p10 }
  0x19   : > { %p356_p2 = pnand %p354_p1, %p351_p9 }
  0x1b   : > { %359 = shalt.err (!%p356_p2)
}
  0x1c   : > { %s462_s30 = smov [#allocation2]   ;;  %p56_p1 = por %p55_p0, %p54_p13 }
  0x1d   : > { %300 = dma.hbm_to_smem (!%p536_p11), %s686_s0, 16, %s462_s30, [#allocation5]  }
  0x1e   : > { %s567_s5 = scalar_select %p540_p12, %s456_s11, %s47_s20  }
  0x1f   : > { %p697_p2 = scmp.eq.s32.totalorder %s502_s13, 1  ;;  %s119_s7 = sand.u32 1, %s456_s11  }
  0x20   : > { %s279_s8 = sshll.u32 %s460_s12, 7  ;;  %s278_s14 = sshll.u32 %s119_s7, 3 }
  0x21   : > { %p579_p9 = por %p697_p2, %p54_p13  ;;  %s588_s23 = scalar_lea.hbm %s687_s1, %s279_s8 }
  0x22   : > { %s123_s20 = scalar_lea.vmem [#allocation6], %s278_s14  ;;  %p592_p11 = pnand %p310_p3, %p56_p1 }
  0x23   : > { %s698_s6 = scalar_select %p579_p9, 1, 0 }
  0x24   : > { %s130_s22 = sshll.u32 %s123_s20, 4  ;;  %s120_s25 = scalar_lea.sflag [#allocation3], %s119_s7  ;;  %s596_s22 = int_to_ptr.vmem [resolvable:$true] %s130_s22 }
  0x25   : > { %s360_s26 = scalar_lea.hbm %s588_s23, 128  ;;  %p362_p13 = pneg %p592_p11 }
  0x26   : > { %p361_p12 = scmp.ne.s32.totalorder %s588_s23, %s360_s26  ;;  %s365_s29 = scalar_lea.hbm %s687_s1, 256 }
  0x27   : > { %p366_p3 = scmp.lt.u32.totalorder %s588_s23, %s687_s1  ;;  %p367_p7 = scmp.lt.u32.totalorder %s365_s29, %s360_s26 }
  0x28   : > { %p363_p0 = pnand %p362_p13, %p361_p12  ;;  %p369_p1 = scmp.lt.u32.totalorder %s360_s26, %s588_s23 }
  0x29   : > { %p368_p10 = por %p367_p7, %p366_p3 }
  0x2a   : > { %p364_p5 = pneg %p363_p0 }
  0x2b   : > { %p370_p2 = por %p369_p1, %p368_p10 }
  0x2d   : > { %p371_p6 = pnand %p370_p2, %p364_p5 }
  0x2f   : > { %374 = shalt.err (!%p371_p6)
}
  0x30   : > { %s375_s4 = scalar_lea.vmem %s596_s22, 128  ;;  %s463_s7 = smov [#allocation6]  }
  0x31   : > { %p376_p12 = scmp.ne.s32.totalorder %s596_s22, %s375_s4  ;;  %s380_s8 = sshll.u32 %s463_s7, 4  ;;  %s381_s8 = int_to_ptr.vmem [resolvable:$false] %s380_s8 }
  0x32   : > { %s382_s14 = scalar_lea.vmem %s381_s8, 256  ;;  %p383_p4 = scmp.lt.s32.totalorder %s596_s22, %s381_s8 }
  0x33   : > { %p378_p0 = pnand %p376_p12, %p362_p13  ;;  %p384_p3 = scmp.lt.s32.totalorder %s382_s14, %s375_s4 }
  0x35   : > { %p379_p9 = pneg %p378_p0  ;;  %p385_p7 = por %p384_p3, %p383_p4 }
  0x37   : > { %p386_p10 = pnand %p385_p7, %p379_p9 }
  0x39   : > { %389 = shalt.err (!%p386_p10)
}
  0x3a   : > { %304 = dma.hbm_to_vmem [thread:$0]  (!%p592_p11), %s588_s23, 128, %s596_s22, %s120_s25  }
  0x3b   : > { %139 = sbr.rel (%p521_p8) target bundleno = 99 (0x63), region = 28  ;;  %p700_p6 = scmp.eq.s32.totalorder (!%p521_p8), %s502_s13, 0 }
  0x42   : > { %435 = dma.done.wait (%p700_p6), [#allocation5], 16   ;;  %p701_p13 = pmov %p700_p6 }
  0x43   : > { %s630_s19 = sand.u32 1, %s452_s10   ;;  %p702_p4 = scmp.ne.s32.totalorder %s692_s15, 0 }
  0x44   : > { %437 = vsyncadd (%p701_p13), [#allocation5], 4294967280  ;;  %s282_s21 = sshll.u32 %s630_s19, 3  ;;  %s146_s20 = scalar_lea.sflag [#allocation3], %s630_s19 }
  0x45   : > { %s149_s24 = scalar_lea.vmem [#allocation6], %s282_s21 }
  0x46   : > { %439 = dma.done.wait (%p702_p4), %s146_s20, 128  }
  0x47   : > { %441 = vsyncadd (%p702_p4), %s146_s20, 4294967168 }
  0x48   : > { %154 = sfence }
  0x49   : > { %s171_s17 = sld [smem:[#allocation2]]  ;;  %v172_v0 = vld [vmem:[%s149_s24] sm:$0xff]  ;;  %s170_s23 = scalar_lea.vmem [#allocation7], %s282_s21  ;;  %v464_v2 = vmov 0.0  }
  0x4a   : > { %s192_s22 = sshll.u32 %s170_s23, 4  ;;  %s286_s25 = sshll.u32 %s502_s13, 7  ;;  %s639_s22 = int_to_ptr.vmem [resolvable:$true] %s192_s22 }
  0x4b   : > { %s644_s15 = scalar_lea.hbm %s688_s2, %s286_s25  ;;  %s179_s28 = scalar_lea.sflag [#allocation4], %s630_s19 }
  0x4c   : > { %s390_s29 = scalar_lea.vmem %s639_s22, 128  ;;  %p703_p9 = scmp.ne.s32.totalorder %s698_s6, 0 }
  0x4d   : > { %p391_p8 = scmp.ne.s32.totalorder %s639_s22, %s390_s29  ;;  %s465_s13 = smov [#allocation7]  }
  0x4e   : > { %s394_s30 = sshll.u32 %s465_s13, 4  ;;  %s395_s30 = int_to_ptr.vmem [resolvable:$false] %s394_s30 }
  0x4f   : > { %v173_v1 = vstv %s171_s17  ;;  %p392_p11 = pnand %p391_p8, %p703_p9  ;;  %s396_s3 = scalar_lea.vmem %s395_s30, 256 }
  0x50   : > { %vm174_vm0 = vcmp.ge.f32.partialorder %v172_v0, %v173_v1  ;;  %p397_p1 = scmp.lt.s32.totalorder %s639_s22, %s395_s30  ;;  %p398_p2 = scmp.lt.s32.totalorder %s396_s3, %s390_s29 }
  0x51   : > { %v284_v3 = vsel %vm174_vm0, 1.0, %v464_v2  ;;  %p393_p5 = pneg %p392_p11 }
  0x52   : > { %177 = vst [vmem:[%s170_s23] sm:$0xff] %v284_v3  ;;  %p399_p12 = por %p398_p2, %p397_p1 }
  0x54   : > { %p400_p0 = pnand %p399_p12, %p393_p5 }
  0x56   : > { %403 = shalt.err (!%p400_p0)
}
  0x57   : > { %s404_s4 = scalar_lea.hbm %s644_s15, 128  ;;  %s408_s14 = scalar_lea.hbm %s688_s2, 256 }
  0x58   : > { %p405_p3 = scmp.ne.s32.totalorder %s644_s15, %s404_s4  ;;  %p409_p6 = scmp.lt.u32.totalorder %s644_s15, %s688_s2 }
  0x59   : > { %p410_p13 = scmp.lt.u32.totalorder %s408_s14, %s404_s4  ;;  %p412_p8 = scmp.lt.u32.totalorder %s404_s4, %s644_s15 }
  0x5a   : > { %p406_p7 = pnand %p405_p3, %p703_p9 }
  0x5b   : > { %p411_p4 = por %p410_p13, %p409_p6 }
  0x5c   : > { %p407_p10 = pneg %p406_p7 }
  0x5d   : > { %p413_p11 = por %p412_p8, %p411_p4 }
  0x5f   : > { %p414_p5 = pnand %p413_p11, %p407_p10 }
  0x61   : > { %417 = shalt.err (!%p414_p5)
}
  0x62   : > { %295 = dma.vmem_to_hbm [thread:$0]  (%p703_p9), %s639_s22, 128, %s644_s15, %s179_s28  }
  0x63 PF: > { %s204_s20 = sand.u32 1, %s448_s9   ;;  %p704_p1 = scmp.ne.s32.totalorder %s693_s16, 0 }
  0x64   : > { %p705_p2 = scmp.ge.s32.totalorder %s460_s12, 2  ;;  %s205_s24 = scalar_lea.sflag [#allocation4], %s204_s20 }
  0x66   : > { %p306_p12 = pnand %p705_p2, %p704_p1 }
  0x68   : > { %443 = dma.done.wait (!%p306_p12), %s205_s24, 128  }
  0x69   : > { %445 = vsyncadd (!%p306_p12), %s205_s24, 4294967168  ;;  %p16_p0 = scmp.ge.s32.totalorder %s527_s18, 4   ;;  %s706_s9 = smov %s452_s10 }
  0x6a   : > { %s707_s10 = smov %s456_s11  ;;  %s708_s11 = smov %s567_s5 }
  0x6b   : > { %s709_s12 = smov %s527_s18  ;;  %18 = sbr.rel (!%p16_p0) target bundleno = 6 (0x6), region = 78 }
  0x72   :  { %210 = vsyncpa [#allocation3], 1 }
  0x73   :  { %212 = vsyncpa [#allocation3 + $0x1], 1 }
  0x74   :  { %213 = vsyncpa [#allocation4], 1 }
  0x75   :  { %215 = vsyncpa [#allocation4 + $0x1], 1 }
  0x76   :  { %216 = vsyncpa [#allocation5], 1 }
  0x77   :  { %218 = vsyncpa [#allocation5 + $0x1], 1 }

</bundles_post_ra>
